<compile_context>
chip_gen: v6e
topology: v6e:2x2x1
jax: 0.10.0
libtpu: 0.0.40
codegen_flags: <defaults>
</compile_context>

<pallas_src>
import functools

import jax
import jax.numpy as jnp
from jax.experimental import pallas as pl
from jax.experimental.pallas import tpu as pltpu


def _round_up(n, m):
    return ((n + m - 1) // m) * m


def _adapter_kernel(x_ref, g_ref, bln_ref, wd_ref, bd_ref, wu_ref, bu_ref, o_ref, *,
                    scaling, eps, activation, has_layer_norm, has_bias, has_residual):
    """Fused adapter forward for one tile of rows.

    x_ref:   (T, D)      input rows (flattened B*S)
    g_ref:   (1, D)      LayerNorm gamma
    bln_ref: (1, D)      LayerNorm beta
    wd_ref:  (D, P)      down projection (already transposed to (in, out))
    bd_ref:  (1, P)      down bias
    wu_ref:  (P, Dout)   up projection (already transposed to (in, out))
    bu_ref:  (1, Dout)   up bias
    o_ref:   (T, Dout)   output rows
    """
    x = x_ref[...]
    xf = x.astype(jnp.float32)

    if has_layer_norm:
        mean = jnp.mean(xf, axis=-1, keepdims=True)
        var = jnp.mean(jnp.square(xf - mean), axis=-1, keepdims=True)
        xn = (xf - mean) * jax.lax.rsqrt(var + eps)
        xn = xn * g_ref[...].astype(jnp.float32) + bln_ref[...].astype(jnp.float32)
    else:
        xn = xf

    # Feed the MXU in the weight's native dtype; accumulate in f32 via
    # preferred_element_type (no explicit f32 upcast of the operands).
    h = jnp.dot(xn.astype(wd_ref.dtype), wd_ref[...],
                preferred_element_type=jnp.float32)
    if has_bias:
        h = h + bd_ref[...].astype(jnp.float32)

    if activation == "relu":
        h = jnp.maximum(h, 0.0)
    elif activation == "gelu":
        h = jax.nn.gelu(h, approximate=True)          # matches nn.GELU(approximate='tanh')
    # activation == "none": identity

    y = jnp.dot(h.astype(wu_ref.dtype), wu_ref[...],
                preferred_element_type=jnp.float32)
    if has_bias:
        y = y + bu_ref[...].astype(jnp.float32)
    y = y * scaling

    if has_residual:
        y = y + xf

    o_ref[...] = y.astype(o_ref.dtype)


def adapter_forward(x, gamma, beta, w_down, b_down, w_up, b_up, *,
                    scaling=1.0, eps=1e-5, activation="relu",
                    has_layer_norm=True, has_bias=True, has_residual=True,
                    block_rows=256):
    """x: (B, S, D).  w_down: (D, P), w_up: (P, Dout) (already (in, out))."""
    B, S, D = x.shape
    P = w_down.shape[1]
    Dout = w_up.shape[1]
    N = B * S

    x2 = x.reshape(N, D)
    tile = min(block_rows, _round_up(N, 8))            # row tile, multiple of 8
    n_pad = _round_up(N, tile)
    if n_pad != N:
        x2 = jnp.pad(x2, ((0, n_pad - N), (0, 0)))

    gamma2 = gamma.reshape(1, D)
    beta2 = beta.reshape(1, D)
    bd2 = b_down.reshape(1, P)
    bu2 = b_up.reshape(1, Dout)

    kernel = functools.partial(
        _adapter_kernel,
        scaling=float(scaling), eps=float(eps), activation=activation,
        has_layer_norm=has_layer_norm, has_bias=has_bias, has_residual=has_residual)

    itemsize = jnp.dtype(x.dtype).itemsize
    bytes_accessed = (x2.size + n_pad * Dout) * itemsize + \
        (gamma2.size + beta2.size + w_down.size + bd2.size + w_up.size + bu2.size) * 4
    cost = pl.CostEstimate(
        flops=2 * n_pad * D * P + 2 * n_pad * P * Dout + 8 * n_pad * D,
        transcendentals=(n_pad * P if activation == "gelu" else 0),
        bytes_accessed=int(bytes_accessed))

    out = pl.pallas_call(
        kernel,
        out_shape=jax.ShapeDtypeStruct((n_pad, Dout), x.dtype),
        grid=(n_pad // tile,),
        in_specs=[
            pl.BlockSpec((tile, D), lambda i: (i, 0)),      # x row tile
            pl.BlockSpec((1, D), lambda i: (0, 0)),         # gamma
            pl.BlockSpec((1, D), lambda i: (0, 0)),         # beta
            pl.BlockSpec((D, P), lambda i: (0, 0)),         # W_down (in, out)
            pl.BlockSpec((1, P), lambda i: (0, 0)),         # b_down
            pl.BlockSpec((P, Dout), lambda i: (0, 0)),      # W_up (in, out)
            pl.BlockSpec((1, Dout), lambda i: (0, 0)),      # b_up
        ],
        out_specs=pl.BlockSpec((tile, Dout), lambda i: (i, 0)),
        compiler_params=pltpu.CompilerParams(dimension_semantics=("parallel",)),
        cost_estimate=cost,
    )(x2, gamma2, beta2, w_down, bd2, w_up, bu2)

    return out[:N].reshape(B, S, Dout)


class AdapterLayerPallas:
    """JAX/Pallas port of pasero AdapterLayer (forward pass only)."""

    def __init__(self, input_dim, projection_dim, output_dim=None, *,
                 layer_norm=True, bias=True, residual=True,
                 activation_fn="relu", scaling=1.0, key=None):
        self.input_dim = input_dim
        self.projection_dim = projection_dim
        self.output_dim = output_dim or input_dim
        self.has_layer_norm = layer_norm
        self.bias = bias
        self.residual = residual
        assert not residual or self.output_dim == self.input_dim
        self.activation = "none" if activation_fn in (None, "none") else activation_fn
        assert self.activation in ("none", "relu", "gelu")
        self.scaling = scaling

        key = key if key is not None else jax.random.PRNGKey(0)
        kd, ku = jax.random.split(key)
        # Stored already transposed to (in, out) so the kernel needs no transpose.
        # (Random scale 0.1 instead of the paper's near-zero init, for a meaningful test.)
        self.w_down = jax.random.normal(kd, (input_dim, projection_dim), jnp.float32) * 0.1
        self.w_up = jax.random.normal(ku, (projection_dim, self.output_dim), jnp.float32) * 0.1
        self.b_down = jnp.zeros((projection_dim,), jnp.float32)
        self.b_up = jnp.zeros((self.output_dim,), jnp.float32)
        self.gamma = jnp.ones((input_dim,), jnp.float32)
        self.beta = jnp.zeros((input_dim,), jnp.float32)

    def __call__(self, x):
        return adapter_forward(
            x, self.gamma, self.beta, self.w_down, self.b_down, self.w_up, self.b_up,
            scaling=self.scaling, activation=self.activation,
            has_layer_norm=self.has_layer_norm, has_bias=self.bias,
            has_residual=self.residual)


def _reference_forward(module, x):
    """Pure-JAX reference mirroring the PyTorch forward."""
    xf = x.astype(jnp.float32)
    residual = xf
    h = xf
    if module.has_layer_norm:
        m = jnp.mean(h, axis=-1, keepdims=True)
        v = jnp.mean(jnp.square(h - m), axis=-1, keepdims=True)
        h = (h - m) / jnp.sqrt(v + 1e-5) * module.gamma + module.beta
    h = h @ module.w_down + (module.b_down if module.bias else 0.0)
    if module.activation == "relu":
        h = jnp.maximum(h, 0.0)
    elif module.activation == "gelu":
        h = jax.nn.gelu(h, approximate=True)
    y = (h @ module.w_up + (module.b_up if module.bias else 0.0)) * module.scaling
    if module.residual:
        y = y + residual
    return y.astype(x.dtype)


if __name__ == "__main__":
    B, S, D, P = 2, 8, 32, 16

    key = jax.random.PRNGKey(0)
    kx, kmod = jax.random.split(key)
    x = jax.random.normal(kx, (B, S, D), jnp.float32)

    module = AdapterLayerPallas(D, P, key=kmod)

    y = module(x)
    y = jax.block_until_ready(y)

    y_ref = _reference_forward(module, x)
    assert y.shape == (B, S, D), y.shape
    assert jnp.allclose(y, y_ref, rtol=1e-4, atol=1e-4), "output mismatch vs reference"

    print("KERNEL_OK")
</pallas_src>

<mosaic_0001>
module attributes {stable_mosaic.version = 11 : i64} {
  func.func @_adapter_kernel(%arg0: i32, %arg1: memref<16x32xf32, #tpu.memory_space<vmem>>, %arg2: memref<1x32xf32, #tpu.memory_space<vmem>>, %arg3: memref<1x32xf32, #tpu.memory_space<vmem>>, %arg4: memref<32x16xf32, #tpu.memory_space<vmem>>, %arg5: memref<1x16xf32, #tpu.memory_space<vmem>>, %arg6: memref<16x32xf32, #tpu.memory_space<vmem>>, %arg7: memref<1x32xf32, #tpu.memory_space<vmem>>, %arg8: memref<16x32xf32, #tpu.memory_space<vmem>>) attributes {dimension_semantics = [#tpu.dimension_semantics<parallel>], iteration_bounds = array<i64: 1>, scalar_prefetch = 0 : i64, scratch_operands = 0 : i64, tpu.core_type = #tpu.core_type<tc>, window_params = [{transform_indices = @transform_0, window_bounds = array<i64: 16, 32>}, {pipeline_mode = #tpu.pipeline_mode<synchronous>, transform_indices = @transform_1, window_bounds = array<i64: 1, 32>}, {pipeline_mode = #tpu.pipeline_mode<synchronous>, transform_indices = @transform_2, window_bounds = array<i64: 1, 32>}, {pipeline_mode = #tpu.pipeline_mode<synchronous>, transform_indices = @transform_3, window_bounds = array<i64: 32, 16>}, {pipeline_mode = #tpu.pipeline_mode<synchronous>, transform_indices = @transform_4, window_bounds = array<i64: 1, 16>}, {pipeline_mode = #tpu.pipeline_mode<synchronous>, transform_indices = @transform_5, window_bounds = array<i64: 16, 32>}, {pipeline_mode = #tpu.pipeline_mode<synchronous>, transform_indices = @transform_6, window_bounds = array<i64: 1, 32>}, {transform_indices = @transform_7, window_bounds = array<i64: 16, 32>}]} {
    %c0 = arith.constant 0 : index
    %c0_0 = arith.constant 0 : index
    %0 = vector.load %arg1[%c0, %c0_0] : memref<16x32xf32, #tpu.memory_space<vmem>>, vector<16x32xf32>
    %cst = arith.constant dense<0.000000e+00> : vector<16xf32>
    %1 = vector.multi_reduction <add>, %0, %cst [1] : vector<16x32xf32> to vector<16xf32>
    %2 = vector.shape_cast %1 : vector<16xf32> to vector<16x1xf32>
    %cst_1 = arith.constant 3.200000e+01 : f32
    %3 = vector.broadcast %cst_1 : f32 to vector<16x1xf32>
    %4 = arith.divf %2, %3 : vector<16x1xf32>
    %5 = vector.broadcast %4 : vector<16x1xf32> to vector<16x32xf32>
    %6 = arith.subf %0, %5 : vector<16x32xf32>
    %7 = arith.mulf %6, %6 : vector<16x32xf32>
    %cst_2 = arith.constant dense<0.000000e+00> : vector<16xf32>
    %8 = vector.multi_reduction <add>, %7, %cst_2 [1] : vector<16x32xf32> to vector<16xf32>
    %9 = vector.shape_cast %8 : vector<16xf32> to vector<16x1xf32>
    %cst_3 = arith.constant 3.200000e+01 : f32
    %10 = vector.broadcast %cst_3 : f32 to vector<16x1xf32>
    %11 = arith.divf %9, %10 : vector<16x1xf32>
    %12 = vector.broadcast %4 : vector<16x1xf32> to vector<16x32xf32>
    %13 = arith.subf %0, %12 : vector<16x32xf32>
    %cst_4 = arith.constant 9.99999974E-6 : f32
    %14 = vector.broadcast %cst_4 : f32 to vector<16x1xf32>
    %15 = arith.addf %11, %14 : vector<16x1xf32>
    %16 = math.rsqrt %15 : vector<16x1xf32>
    %17 = vector.broadcast %16 : vector<16x1xf32> to vector<16x32xf32>
    %18 = arith.mulf %13, %17 : vector<16x32xf32>
    %c0_5 = arith.constant 0 : index
    %c0_6 = arith.constant 0 : index
    %19 = vector.load %arg2[%c0_5, %c0_6] : memref<1x32xf32, #tpu.memory_space<vmem>>, vector<1x32xf32>
    %20 = vector.broadcast %19 : vector<1x32xf32> to vector<16x32xf32>
    %21 = arith.mulf %18, %20 : vector<16x32xf32>
    %c0_7 = arith.constant 0 : index
    %c0_8 = arith.constant 0 : index
    %22 = vector.load %arg3[%c0_7, %c0_8] : memref<1x32xf32, #tpu.memory_space<vmem>>, vector<1x32xf32>
    %23 = vector.broadcast %22 : vector<1x32xf32> to vector<16x32xf32>
    %24 = arith.addf %21, %23 : vector<16x32xf32>
    %c0_9 = arith.constant 0 : index
    %c0_10 = arith.constant 0 : index
    %25 = vector.load %arg4[%c0_9, %c0_10] : memref<32x16xf32, #tpu.memory_space<vmem>>, vector<32x16xf32>
    %cst_11 = arith.constant dense<0.000000e+00> : vector<16x16xf32>
    %26 = tpu.matmul %24, %25, %cst_11 {dimension_numbers = #tpu.dot_dimension_numbers<[1], [0], [0], [1], [0, 0, 1, 1], [], []>} : vector<16x32xf32>, vector<32x16xf32>, vector<16x16xf32> -> vector<16x16xf32>
    %c0_12 = arith.constant 0 : index
    %c0_13 = arith.constant 0 : index
    %27 = vector.load %arg5[%c0_12, %c0_13] : memref<1x16xf32, #tpu.memory_space<vmem>>, vector<1x16xf32>
    %28 = vector.broadcast %27 : vector<1x16xf32> to vector<16x16xf32>
    %29 = arith.addf %26, %28 : vector<16x16xf32>
    %cst_14 = arith.constant 0.000000e+00 : f32
    %30 = vector.broadcast %cst_14 : f32 to vector<16x16xf32>
    %31 = arith.maximumf %29, %30 : vector<16x16xf32>
    %c0_15 = arith.constant 0 : index
    %c0_16 = arith.constant 0 : index
    %32 = vector.load %arg6[%c0_15, %c0_16] : memref<16x32xf32, #tpu.memory_space<vmem>>, vector<16x32xf32>
    %cst_17 = arith.constant dense<0.000000e+00> : vector<16x32xf32>
    %33 = tpu.matmul %31, %32, %cst_17 {dimension_numbers = #tpu.dot_dimension_numbers<[1], [0], [0], [1], [0, 0, 1, 1], [], []>} : vector<16x16xf32>, vector<16x32xf32>, vector<16x32xf32> -> vector<16x32xf32>
    %c0_18 = arith.constant 0 : index
    %c0_19 = arith.constant 0 : index
    %34 = vector.load %arg7[%c0_18, %c0_19] : memref<1x32xf32, #tpu.memory_space<vmem>>, vector<1x32xf32>
    %35 = vector.broadcast %34 : vector<1x32xf32> to vector<16x32xf32>
    %36 = arith.addf %33, %35 : vector<16x32xf32>
    %cst_20 = arith.constant 1.000000e+00 : f32
    %37 = vector.broadcast %cst_20 : f32 to vector<16x32xf32>
    %38 = arith.mulf %36, %37 : vector<16x32xf32>
    %39 = arith.addf %38, %0 : vector<16x32xf32>
    %c0_21 = arith.constant 0 : index
    %c0_22 = arith.constant 0 : index
    %40 = vector.load %arg8[%c0_21, %c0_22] : memref<16x32xf32, #tpu.memory_space<vmem>>, vector<16x32xf32>
    tpu.vector_store %arg8[%c0_21, %c0_22], %39 {strides = array<i32>} : memref<16x32xf32, #tpu.memory_space<vmem>>, vector<16x32xf32>,
    return
  }
  func.func @transform_0(%arg0: i32) -> (i32, i32) {
    %c0_i32 = arith.constant 0 : i32
    %c0_i32_0 = arith.constant 0 : i32
    return %arg0, %c0_i32 : i32, i32
  }
  func.func @transform_1(%arg0: i32) -> (i32, i32) {
    %c0_i32 = arith.constant 0 : i32
    %c0_i32_0 = arith.constant 0 : i32
    %c0_i32_1 = arith.constant 0 : i32
    return %c0_i32, %c0_i32_0 : i32, i32
  }
  func.func @transform_2(%arg0: i32) -> (i32, i32) {
    %c0_i32 = arith.constant 0 : i32
    %c0_i32_0 = arith.constant 0 : i32
    %c0_i32_1 = arith.constant 0 : i32
    return %c0_i32, %c0_i32_0 : i32, i32
  }
  func.func @transform_3(%arg0: i32) -> (i32, i32) {
    %c0_i32 = arith.constant 0 : i32
    %c0_i32_0 = arith.constant 0 : i32
    %c0_i32_1 = arith.constant 0 : i32
    return %c0_i32, %c0_i32_0 : i32, i32
  }
  func.func @transform_4(%arg0: i32) -> (i32, i32) {
    %c0_i32 = arith.constant 0 : i32
    %c0_i32_0 = arith.constant 0 : i32
    %c0_i32_1 = arith.constant 0 : i32
    return %c0_i32, %c0_i32_0 : i32, i32
  }
  func.func @transform_5(%arg0: i32) -> (i32, i32) {
    %c0_i32 = arith.constant 0 : i32
    %c0_i32_0 = arith.constant 0 : i32
    %c0_i32_1 = arith.constant 0 : i32
    return %c0_i32, %c0_i32_0 : i32, i32
  }
  func.func @transform_6(%arg0: i32) -> (i32, i32) {
    %c0_i32 = arith.constant 0 : i32
    %c0_i32_0 = arith.constant 0 : i32
    %c0_i32_1 = arith.constant 0 : i32
    return %c0_i32, %c0_i32_0 : i32, i32
  }
  func.func @transform_7(%arg0: i32) -> (i32, i32) {
    %c0_i32 = arith.constant 0 : i32
    %c0_i32_0 = arith.constant 0 : i32
    return %arg0, %c0_i32 : i32, i32
  }
}

</mosaic_0001>

<bundles_post_ra>
// kernel: tpu_custom_call.1
= control target key start
LH: loop header
LB: loop body
LE: loop exit
PB: predicated region body
PF: predicated region fallthrough
CT: control target
= control target key end

     0   :  { %vm29_vm0 = vcmask 261120   ;;  %s445_s0 = inlined_call_operand.vmem [shape: f32[16,32], index: 0, kind: input, shape index: {}]   ;;  %s446_s1 = inlined_call_operand.vmem [shape: f32[1,32], index: 1, kind: input, shape index: {}]   ;;  %s447_s2 = inlined_call_operand.vmem [shape: f32[1,32], index: 2, kind: input, shape index: {}]   ;;  %s448_s3 = inlined_call_operand.vmem [shape: f32[32,16], index: 3, kind: input, shape index: {}]   ;;  %s449_s4 = inlined_call_operand.vmem [shape: f32[1,16], index: 4, kind: input, shape index: {}]   ;;  %s450_s5 = inlined_call_operand.vmem [shape: f32[16,32], index: 5, kind: input, shape index: {}]   ;;  %s451_s6 = inlined_call_operand.vmem [shape: f32[1,32], index: 6, kind: input, shape index: {}]   ;;  %s452_s7 = inlined_call_operand.hbm [shape: f32[16,32], index: 7, kind: output, shape index: {}]  }
   0x1   :  { %v391_v0 = vld [vmem:[%s445_s0] sm:$0xff]  ;;  %v396_v1 = vld [vmem:[%s445_s0 + $0x8] sm:$0xff] }
   0x2   :  { %12 = vsyncpa [#allocation3], 0  ;;  %v30_v2 = vsel %vm29_vm0, %v391_v0, 0.0  ;;  %v33_v3 = vsel %vm29_vm0, %v396_v1, 0.0  ;;  %v78_v14 = vld [vmem:[%s448_s3 + $0x18] sm:$0xff]  ;;  %v77_v15 = vld [vmem:[%s448_s3 + $0x10] sm:$0xff] }
   0x3   :  { %31 = vadd.xlane.f32.xlu0 %v30_v2  ;;  %298 = vmatprep.subr.mxu0 %v78_v14  ;;  %v76_v16 = vld [vmem:[%s448_s3 + $0x8] sm:$0xff]  ;;  %v75_v17 = vld [vmem:[%s448_s3] sm:$0xff]  ;;  %vm178_vm1 = vcmask 130048  }
   0x4   :  { %299 = vmatpush3.msra.mxu0 %v78_v14  ;;  %v280_v25 = vld [vmem:[%s446_s1] ss:$0 sm:$0xff]  ;;  %v170_v34 = vld [vmem:[%s450_s5 + $0x8] sm:$0xff] }
   0x5   :  { %300 = vmatprep.subr.mxu0 %v77_v15  ;;  %v281_v27 = vld [vmem:[%s447_s2] ss:$0 sm:$0xff]  ;;  %309 = vmatprep.subr.mxu1 %v170_v34 }
   0x6   :  { %301 = vmatpush3.msra.mxu0 %v77_v15  ;;  %310 = vmatpush3.msra.mxu1 %v170_v34  ;;  %v169_v35 = vld [vmem:[%s450_s5] sm:$0xff]  ;;  %s345_s5 = smov [#allocation2]  }
   0x7   :  { %34 = vadd.xlane.f32.xlu0 %v33_v3  ;;  %302 = vmatprep.subr.mxu0 %v76_v16  ;;  %v282_v36 = vld [vmem:[%s449_s4] ss:$0 sm:$0xff]  ;;  %s269_s21 = sshll.u32 %s345_s5, 4  ;;  %s270_s21 = int_to_ptr.vmem [resolvable:$true] %s269_s21 }
   0x8   :  { %303 = vmatpush3.msra.mxu0 %v76_v16  ;;  %311 = vmatprep.subr.mxu1 %v169_v35  ;;  %v285_v43 = vld [vmem:[%s451_s6] ss:$0 sm:$0xff]  ;;  %s323_s4 = scalar_lea.vmem %s270_s21, 256  ;;  %p328_p1 = scmp.lt.s32.totalorder %s270_s21, %s270_s21 }
   0x9   :  { %304 = vmatprep.subr.mxu0 %v75_v17  ;;  %312 = vmatpush3.msra.mxu1 %v169_v35  ;;  %p324_p0 = scmp.ne.s32.totalorder %s270_s21, %s323_s4  ;;  %p329_p2 = scmp.lt.s32.totalorder %s323_s4, %s323_s4 }
   0xa   :  { %305 = vmatpush3.msra.mxu0 %v75_v17 }
   0xb   :  { %p330_p3 = por %p329_p2, %p328_p1 }
   0xd   :  { %p331_p4 = pnand %p330_p3, %p324_p0 }
  0x8c   :  { %v32_v4 = vpop.xlane.xlu0 %31 }
  0x8d   :  { %v37_v5 = vmul.f32 0.03125, %v32_v4 }
  0x8f   :  { %v39_v6 = vsub.f32 %v391_v0, %v37_v5 }
  0x90   :  { %v35_v7 = vpop.xlane.xlu0 %34 }
  0x91   :  { %v38_v8 = vmul.f32 0.03125, %v35_v7  ;;  %v41_v9 = vmul.f32 %v39_v6, %v39_v6 }
  0x93   :  { %v40_v10 = vsub.f32 %v396_v1, %v38_v8  ;;  %v43_v11 = vsel %vm29_vm0, %v41_v9, 0.0 }
  0x94   :  { %44 = vadd.xlane.f32.xlu1 %v43_v11 }
  0x95   :  { %v42_v12 = vmul.f32 %v40_v10, %v40_v10 }
  0x97   :  { %v46_v13 = vsel %vm29_vm0, %v42_v12, 0.0 }
  0x98   :  { %47 = vadd.xlane.f32.xlu1 %v46_v13 }
 0x11d   :  { %v45_v18 = vpop.xlane.xlu1 %44 }
 0x11e   :  { %v49_v19 = vmul.f32 0.03125, %v45_v18 }
 0x120   :  { %v51_v20 = vadd.f32 1e-05, %v49_v19 }
 0x121   :  { %v48_v21 = vpop.xlane.xlu1 %47 }
 0x122   :  { %319 = vrsqrt.f32 %v51_v20  ;;  %v50_v22 = vmul.f32 0.03125, %v48_v21 }
 0x124   :  { %v52_v23 = vadd.f32 1e-05, %v50_v22 }
 0x126   :  { %321 = vrsqrt.f32 %v52_v23 }
 0x12f   :  { %v320_v24 = vpop.eup %319 }
 0x130   :  { %v55_v26 = vmul.f32 %v320_v24, %v39_v6 }
 0x132   :  { %v64_v28 = vmul.f32 %v280_v25, %v55_v26 }
 0x133   :  { %v322_v29 = vpop.eup %321 }
 0x134   :  { %v56_v30 = vmul.f32 %v322_v29, %v40_v10  ;;  %v73_v31 = vadd.f32 %v281_v27, %v64_v28 }
 0x136   :  { %v65_v32 = vmul.f32 %v280_v25, %v56_v30  ;;  %306 = vmatprep.mubr.msk.f32.mxu0 %vm29_vm0, %v73_v31 }
 0x138   :  { %v74_v33 = vadd.f32 %v281_v27, %v65_v32 }
 0x13a   :  { %307 = vmatmul.mubr.msk.f32.vlgmr.msra.gmra.mxu0 %vm29_vm0, %v74_v33 }
 0x1fa   :  { %v308_v37 = vpop.f32.mrf.mxu0 }
 0x1fb   :  { %v164_v38 = vadd.f32 %v308_v37, %v282_v36 }
 0x1fc   :  { %v158_v39 = vpop.f32.mrf.mxu0 }
 0x1fd   :  { %v159_v40 = vadd.f32 %v282_v36, %v158_v39  ;;  %v168_v42 = vmax.f32 %v164_v38, 0.0 }
 0x1ff   :  { %v167_v41 = vmax.f32 %v159_v40, 0.0 }
 0x201   :  { %313 = vmatprep.mubr.msk.f32.mxu1 %vm178_vm1, %v167_v41 }
 0x202   :  { %314 = vmatmul.mubr.msk.f32.vlgmr.msra.gmra.mxu1 %vm178_vm1, %v168_v42 }
 0x2c2   :  { %v315_v44 = vpop.f32.mrf.mxu1 }
 0x2c3   :  { %v257_v45 = vadd.f32 %v315_v44, %v285_v43 }
 0x2c4   :  { %v251_v46 = vpop.f32.mrf.mxu1 }
 0x2c5   :  { %v261_v47 = vadd.f32 %v257_v45, %v396_v1  ;;  %v252_v48 = vadd.f32 %v285_v43, %v251_v46 }
 0x2c7   :  { %263 = vst.msk [vmem:[#allocation2 + $0x8] sm:$0xff] %vm29_vm0, %v261_v47  ;;  %v260_v49 = vadd.f32 %v252_v48, %v391_v0 }
 0x2c9   :  { %262 = vst.msk [vmem:[#allocation2] sm:$0xff] %vm29_vm0, %v260_v49 }
 0x2ca   :  { %334 = shalt.err (!%p331_p4)
}
 0x2cb   :  { %s346_s6 = smov 128   ;;  %s347_s22 = smov 8  }
 0x2cc   :  { %275 = dma.vmem_to_hbm [thread:$0]  %s270_s21, 256, %s452_s7, [#allocation3], %s346_s6, %s346_s6, %s347_s22  }
 0x2cd   :  { %343 = dma.done.wait [#allocation3], 256  }
 0x2ce   :  { %344 = vsyncadd [#allocation3], 4294967040 }
 0x2cf   :  { %279 = vsyncpa [#allocation3], 1 }

</bundles_post_ra>
